<compile_context>
chip_gen: v7x
topology: tpu7x:2x2x1
jax: 0.10.0
libtpu: 0.0.40
codegen_flags: <defaults>
</compile_context>

<pallas_src>
import functools

import jax
import jax.numpy as jnp
from jax.experimental import pallas as pl
from jax.experimental.pallas import tpu as pltpu


_MAX_TILE = 4096   # batch rows per grid step; f32 working set ~6 MiB << VMEM


def _round_up(n, m):
    return ((n + m - 1) // m) * m


def _choose_tile(batch):
    """Batch tile: as large as possible (the kernel is step-overhead /
    HBM-stream bound), a multiple of 128 so internal activations are
    lane-dense, and small enough that the grid has >=2 steps whenever the
    batch allows it (v7x 2-TC sharding)."""
    tb = min(_MAX_TILE, _round_up(pl.cdiv(batch, 2), 128))
    if tb >= batch:
        tb = batch          # single full-extent block (block dim == array dim)
    return tb


def _make_kernel(layer_dims):
    """Fused encoder+decoder forward on one [tile, input_dim] batch block.

    layer_dims: static tuple of (din, dout, has_relu) per folded layer.
    Each layer is y = relu(W' @ h + t') with BN(eval)+bias pre-folded.
    Activations are lane-dense [features, tile]; the input/output transposes
    run on the XLU (idle otherwise).
    """

    def kernel(x_ref, w_ref, t_ref, out_ref):
        # [tile, din0] -> [din0, tile]; cast first so the XLU moves the
        # (possibly bf16) narrow type.
        h = x_ref[...].astype(w_ref.dtype).T
        for l, (din, dout, has_relu) in enumerate(layer_dims):
            w = w_ref[l, :dout, :din]                         # [dout, din]
            t = t_ref[l, :dout, :]                            # [dout, 1] f32
            y = jnp.dot(w, h, preferred_element_type=jnp.float32) + t
            if has_relu:
                h = jnp.maximum(y, 0.0).astype(w_ref.dtype)
            else:
                h = y                                         # final Linear
        out_ref[...] = h.astype(out_ref.dtype).T              # [tile, out_dim]

    return kernel


def init_params(key, input_dim, hidden_dims=(64, 32, 16)):
    """Deterministic synthetic parameters matching the PyTorch module shapes.

    Returns per-layer tuples (W, b, scale, shift) for Linear+BN layers and
    (W, b) for the final Linear, with W in PyTorch [out, in] layout and the
    BN(eval) already reduced to a per-feature affine (scale, shift).
    """
    hidden_dims = list(hidden_dims)
    layer_dims = []
    prev = input_dim
    for d in hidden_dims:                      # encoder
        layer_dims.append((prev, d, True))
        prev = d
    for d in hidden_dims[::-1][1:]:            # decoder hidden layers
        layer_dims.append((prev, d, True))
        prev = d
    layer_dims.append((prev, input_dim, False))  # final decoder Linear

    params = []
    for (din, dout, has_bn) in layer_dims:
        key, kw, kb, kg, kbe, km, kv = jax.random.split(key, 7)
        w = jax.random.normal(kw, (dout, din), jnp.float32) * 0.1
        b = jax.random.normal(kb, (1, dout), jnp.float32) * 0.1
        if has_bn:
            gamma = 1.0 + 0.1 * jax.random.normal(kg, (1, dout), jnp.float32)
            beta = 0.1 * jax.random.normal(kbe, (1, dout), jnp.float32)
            running_mean = 0.1 * jax.random.normal(km, (1, dout), jnp.float32)
            running_var = 0.5 + jnp.abs(jax.random.normal(kv, (1, dout),
                                                          jnp.float32))
            eps = 1e-5
            scale = gamma / jnp.sqrt(running_var + eps)
            shift = beta - running_mean * scale
            params.append((w, b, scale, shift))
        else:
            params.append((w, b))
    return params


def fold_params(params, compute_dtype=jnp.float32):
    """Fold BN(eval)+bias into (W', t') per layer and pack all layers into two
    zero-padded resident operands.

    (h @ W.T + b) * s + t == h @ (s*W).T + (b*s + t); in the [features, tile]
    kernel layout each layer becomes W' @ h + t' with t' a [dout, 1] column.

    Returns (w_stack [L, Dmax, Dmax] compute_dtype,
             t_stack [L, Dmax, 1]   float32,
             layer_dims static tuple of (din, dout, has_relu)).
    """
    folded = []
    for (w, b, s, t) in params[:-1]:
        w_f = w * s.reshape(-1, 1)                 # [dout, din]
        t_f = (b * s + t).reshape(-1, 1)           # [dout, 1]
        folded.append((w_f, t_f, True))
    w, b = params[-1]
    folded.append((w, b.reshape(-1, 1), False))

    dmax = _round_up(max(max(w_f.shape) for w_f, _, _ in folded), 8)
    n_layers = len(folded)
    w_stack = jnp.zeros((n_layers, dmax, dmax), compute_dtype)
    t_stack = jnp.zeros((n_layers, dmax, 1), jnp.float32)
    layer_dims = []
    for l, (w_f, t_f, has_relu) in enumerate(folded):
        dout, din = w_f.shape
        w_stack = w_stack.at[l, :dout, :din].set(w_f.astype(compute_dtype))
        t_stack = t_stack.at[l, :dout, :].set(t_f)
        layer_dims.append((din, dout, has_relu))
    return w_stack, t_stack, tuple(layer_dims)


@functools.partial(jax.jit, static_argnames=("layer_dims",))
def autoencoder_forward(x, w_stack, t_stack, *, layer_dims):
    """x: [batch, input_dim] -> reconstruction [batch, input_dim] (x.dtype)."""
    batch, input_dim = x.shape
    out_dim = layer_dims[-1][1]
    n_layers, dmax, _ = w_stack.shape

    tb = _choose_tile(batch)
    grid = (pl.cdiv(batch, tb),)                   # ragged last tile OK

    return pl.pallas_call(
        _make_kernel(layer_dims),
        out_shape=jax.ShapeDtypeStruct((batch, out_dim), x.dtype),
        grid=grid,
        in_specs=[
            # streamed batch tile in its native [batch, input_dim] layout
            pl.BlockSpec((tb, input_dim), lambda i: (i, 0)),
            # folded weights / biases: whole-array blocks with a constant
            # index_map -> DMA'd once, VMEM-resident across all grid steps
            pl.BlockSpec((n_layers, dmax, dmax), lambda i: (0, 0, 0)),
            pl.BlockSpec((n_layers, dmax, 1), lambda i: (0, 0, 0)),
        ],
        out_specs=pl.BlockSpec((tb, out_dim), lambda i: (i, 0)),
        compiler_params=pltpu.CompilerParams(
            dimension_semantics=("parallel",),
        ),
    )(x, w_stack, t_stack)


def reference_forward(x, params):
    """Pure-JAX reference (eval-mode semantics, unfused params)."""
    h = x
    for (w, b, s, t) in params[:-1]:
        h = jnp.maximum((h @ w.T + b) * s + t, 0.0)
    w, b = params[-1]
    return h @ w.T + b


if __name__ == "__main__":
    key = jax.random.PRNGKey(0)
    k_params, k_x, k_x2 = jax.random.split(key, 3)

    batch = 16
    input_dim = 32
    hidden_dims = (64, 32, 16)

    params = init_params(k_params, input_dim, hidden_dims)

    # fp32 path — small batch, single full-extent block.
    w_f32, t_f32, layer_dims = fold_params(params, jnp.float32)
    x = jax.random.normal(k_x, (batch, input_dim), jnp.float32)
    out = jax.block_until_ready(
        autoencoder_forward(x, w_f32, t_f32, layer_dims=layer_dims))
    ref = reference_forward(x, params)
    assert out.shape == (batch, input_dim)
    assert jnp.allclose(out, ref, atol=1e-4, rtol=1e-4), "mismatch vs reference"

    # Non-aligned larger batch exercises the pl.cdiv grid (2 parallel steps,
    # ragged last tile) with no wrapper-side pad/transpose.
    x2 = jax.random.normal(k_x2, (1000, input_dim), jnp.float32)
    out2 = jax.block_until_ready(
        autoencoder_forward(x2, w_f32, t_f32, layer_dims=layer_dims))
    ref2 = reference_forward(x2, params)
    assert out2.shape == (1000, input_dim)
    assert jnp.allclose(out2, ref2, atol=1e-4, rtol=1e-4), "mismatch (batch=1000)"

    # bf16 streaming path (v5e/v6e): bf16 weights + bf16 x/out, fp32 accumulate.
    w_bf16, t_bf16, _ = fold_params(params, jnp.bfloat16)
    out_bf16 = jax.block_until_ready(
        autoencoder_forward(x2.astype(jnp.bfloat16), w_bf16, t_bf16,
                            layer_dims=layer_dims))
    assert out_bf16.shape == (1000, input_dim)
    assert out_bf16.dtype == jnp.bfloat16
    assert jnp.allclose(out_bf16.astype(jnp.float32), ref2,
                        atol=5e-2, rtol=5e-2), "mismatch (bf16 path)"

    print("KERNEL_OK")
</pallas_src>

<mosaic_0001>
module attributes {stable_mosaic.version = 11 : i64} {
  func.func @kernel(%arg0: i32, %arg1: memref<16x32xf32, #tpu.memory_space<vmem>>, %arg2: memref<6x64x64xf32, #tpu.memory_space<vmem>>, %arg3: memref<6x64x1xf32, #tpu.memory_space<vmem>>, %arg4: memref<16x32xf32, #tpu.memory_space<vmem>>) attributes {dimension_semantics = [#tpu.dimension_semantics<parallel>], iteration_bounds = array<i64: 1>, scalar_prefetch = 0 : i64, scratch_operands = 0 : i64, tpu.core_type = #tpu.core_type<tc>, window_params = [{transform_indices = @transform_0, window_bounds = array<i64: 16, 32>}, {pipeline_mode = #tpu.pipeline_mode<synchronous>, transform_indices = @transform_1, window_bounds = array<i64: 6, 64, 64>}, {pipeline_mode = #tpu.pipeline_mode<synchronous>, transform_indices = @transform_2, window_bounds = array<i64: 6, 64, 1>}, {transform_indices = @transform_3, window_bounds = array<i64: 16, 32>}]} {
    %c0 = arith.constant 0 : index
    %c0_0 = arith.constant 0 : index
    %0 = vector.load %arg1[%c0, %c0_0] : memref<16x32xf32, #tpu.memory_space<vmem>>, vector<16x32xf32>
    %1 = tpu.transpose %0, [1, 0] : vector<16x32xf32> -> vector<32x16xf32>
    %c0_1 = arith.constant 0 : index
    %c0_2 = arith.constant 0 : index
    %c0_3 = arith.constant 0 : index
    %2 = vector.load %arg2[%c0_1, %c0_2, %c0_3] : memref<6x64x64xf32, #tpu.memory_space<vmem>>, vector<1x64x32xf32>
    %3 = vector.shape_cast %2 : vector<1x64x32xf32> to vector<64x32xf32>
    %c0_4 = arith.constant 0 : index
    %c0_5 = arith.constant 0 : index
    %c0_6 = arith.constant 0 : index
    %4 = vector.load %arg3[%c0_4, %c0_5, %c0_6] : memref<6x64x1xf32, #tpu.memory_space<vmem>>, vector<1x64x1xf32>
    %5 = vector.shape_cast %4 : vector<1x64x1xf32> to vector<64x1xf32>
    %cst = arith.constant dense<0.000000e+00> : vector<64x16xf32>
    %6 = tpu.matmul %3, %1, %cst {dimension_numbers = #tpu.dot_dimension_numbers<[1], [0], [0], [1], [0, 0, 1, 1], [], []>} : vector<64x32xf32>, vector<32x16xf32>, vector<64x16xf32> -> vector<64x16xf32>
    %7 = vector.broadcast %5 : vector<64x1xf32> to vector<64x16xf32>
    %8 = arith.addf %6, %7 : vector<64x16xf32>
    %cst_7 = arith.constant 0.000000e+00 : f32
    %9 = vector.broadcast %cst_7 : f32 to vector<64x16xf32>
    %10 = arith.maximumf %8, %9 : vector<64x16xf32>
    %c1 = arith.constant 1 : index
    %c0_8 = arith.constant 0 : index
    %c0_9 = arith.constant 0 : index
    %11 = vector.load %arg2[%c1, %c0_8, %c0_9] : memref<6x64x64xf32, #tpu.memory_space<vmem>>, vector<1x32x64xf32>
    %12 = vector.shape_cast %11 : vector<1x32x64xf32> to vector<32x64xf32>
    %c1_10 = arith.constant 1 : index
    %c0_11 = arith.constant 0 : index
    %c0_12 = arith.constant 0 : index
    %13 = vector.load %arg3[%c1_10, %c0_11, %c0_12] : memref<6x64x1xf32, #tpu.memory_space<vmem>>, vector<1x32x1xf32>
    %14 = vector.shape_cast %13 : vector<1x32x1xf32> to vector<32x1xf32>
    %cst_13 = arith.constant dense<0.000000e+00> : vector<32x16xf32>
    %15 = tpu.matmul %12, %10, %cst_13 {dimension_numbers = #tpu.dot_dimension_numbers<[1], [0], [0], [1], [0, 0, 1, 1], [], []>} : vector<32x64xf32>, vector<64x16xf32>, vector<32x16xf32> -> vector<32x16xf32>
    %16 = vector.broadcast %14 : vector<32x1xf32> to vector<32x16xf32>
    %17 = arith.addf %15, %16 : vector<32x16xf32>
    %cst_14 = arith.constant 0.000000e+00 : f32
    %18 = vector.broadcast %cst_14 : f32 to vector<32x16xf32>
    %19 = arith.maximumf %17, %18 : vector<32x16xf32>
    %c2 = arith.constant 2 : index
    %c0_15 = arith.constant 0 : index
    %c0_16 = arith.constant 0 : index
    %20 = vector.load %arg2[%c2, %c0_15, %c0_16] : memref<6x64x64xf32, #tpu.memory_space<vmem>>, vector<1x16x32xf32>
    %21 = vector.shape_cast %20 : vector<1x16x32xf32> to vector<16x32xf32>
    %c2_17 = arith.constant 2 : index
    %c0_18 = arith.constant 0 : index
    %c0_19 = arith.constant 0 : index
    %22 = vector.load %arg3[%c2_17, %c0_18, %c0_19] : memref<6x64x1xf32, #tpu.memory_space<vmem>>, vector<1x16x1xf32>
    %23 = vector.shape_cast %22 : vector<1x16x1xf32> to vector<16x1xf32>
    %cst_20 = arith.constant dense<0.000000e+00> : vector<16x16xf32>
    %24 = tpu.matmul %21, %19, %cst_20 {dimension_numbers = #tpu.dot_dimension_numbers<[1], [0], [0], [1], [0, 0, 1, 1], [], []>} : vector<16x32xf32>, vector<32x16xf32>, vector<16x16xf32> -> vector<16x16xf32>
    %25 = vector.broadcast %23 : vector<16x1xf32> to vector<16x16xf32>
    %26 = arith.addf %24, %25 : vector<16x16xf32>
    %cst_21 = arith.constant 0.000000e+00 : f32
    %27 = vector.broadcast %cst_21 : f32 to vector<16x16xf32>
    %28 = arith.maximumf %26, %27 : vector<16x16xf32>
    %c3 = arith.constant 3 : index
    %c0_22 = arith.constant 0 : index
    %c0_23 = arith.constant 0 : index
    %29 = vector.load %arg2[%c3, %c0_22, %c0_23] : memref<6x64x64xf32, #tpu.memory_space<vmem>>, vector<1x32x16xf32>
    %30 = vector.shape_cast %29 : vector<1x32x16xf32> to vector<32x16xf32>
    %c3_24 = arith.constant 3 : index
    %c0_25 = arith.constant 0 : index
    %c0_26 = arith.constant 0 : index
    %31 = vector.load %arg3[%c3_24, %c0_25, %c0_26] : memref<6x64x1xf32, #tpu.memory_space<vmem>>, vector<1x32x1xf32>
    %32 = vector.shape_cast %31 : vector<1x32x1xf32> to vector<32x1xf32>
    %cst_27 = arith.constant dense<0.000000e+00> : vector<32x16xf32>
    %33 = tpu.matmul %30, %28, %cst_27 {dimension_numbers = #tpu.dot_dimension_numbers<[1], [0], [0], [1], [0, 0, 1, 1], [], []>} : vector<32x16xf32>, vector<16x16xf32>, vector<32x16xf32> -> vector<32x16xf32>
    %34 = vector.broadcast %32 : vector<32x1xf32> to vector<32x16xf32>
    %35 = arith.addf %33, %34 : vector<32x16xf32>
    %cst_28 = arith.constant 0.000000e+00 : f32
    %36 = vector.broadcast %cst_28 : f32 to vector<32x16xf32>
    %37 = arith.maximumf %35, %36 : vector<32x16xf32>
    %c4 = arith.constant 4 : index
    %c0_29 = arith.constant 0 : index
    %c0_30 = arith.constant 0 : index
    %38 = vector.load %arg2[%c4, %c0_29, %c0_30] : memref<6x64x64xf32, #tpu.memory_space<vmem>>, vector<1x64x32xf32>
    %39 = vector.shape_cast %38 : vector<1x64x32xf32> to vector<64x32xf32>
    %c4_31 = arith.constant 4 : index
    %c0_32 = arith.constant 0 : index
    %c0_33 = arith.constant 0 : index
    %40 = vector.load %arg3[%c4_31, %c0_32, %c0_33] : memref<6x64x1xf32, #tpu.memory_space<vmem>>, vector<1x64x1xf32>
    %41 = vector.shape_cast %40 : vector<1x64x1xf32> to vector<64x1xf32>
    %cst_34 = arith.constant dense<0.000000e+00> : vector<64x16xf32>
    %42 = tpu.matmul %39, %37, %cst_34 {dimension_numbers = #tpu.dot_dimension_numbers<[1], [0], [0], [1], [0, 0, 1, 1], [], []>} : vector<64x32xf32>, vector<32x16xf32>, vector<64x16xf32> -> vector<64x16xf32>
    %43 = vector.broadcast %41 : vector<64x1xf32> to vector<64x16xf32>
    %44 = arith.addf %42, %43 : vector<64x16xf32>
    %cst_35 = arith.constant 0.000000e+00 : f32
    %45 = vector.broadcast %cst_35 : f32 to vector<64x16xf32>
    %46 = arith.maximumf %44, %45 : vector<64x16xf32>
    %c5 = arith.constant 5 : index
    %c0_36 = arith.constant 0 : index
    %c0_37 = arith.constant 0 : index
    %47 = vector.load %arg2[%c5, %c0_36, %c0_37] : memref<6x64x64xf32, #tpu.memory_space<vmem>>, vector<1x32x64xf32>
    %48 = vector.shape_cast %47 : vector<1x32x64xf32> to vector<32x64xf32>
    %c5_38 = arith.constant 5 : index
    %c0_39 = arith.constant 0 : index
    %c0_40 = arith.constant 0 : index
    %49 = vector.load %arg3[%c5_38, %c0_39, %c0_40] : memref<6x64x1xf32, #tpu.memory_space<vmem>>, vector<1x32x1xf32>
    %50 = vector.shape_cast %49 : vector<1x32x1xf32> to vector<32x1xf32>
    %cst_41 = arith.constant dense<0.000000e+00> : vector<32x16xf32>
    %51 = tpu.matmul %48, %46, %cst_41 {dimension_numbers = #tpu.dot_dimension_numbers<[1], [0], [0], [1], [0, 0, 1, 1], [], []>} : vector<32x64xf32>, vector<64x16xf32>, vector<32x16xf32> -> vector<32x16xf32>
    %52 = vector.broadcast %50 : vector<32x1xf32> to vector<32x16xf32>
    %53 = arith.addf %51, %52 : vector<32x16xf32>
    %54 = tpu.transpose %53, [1, 0] : vector<32x16xf32> -> vector<16x32xf32>
    %c0_42 = arith.constant 0 : index
    %c0_43 = arith.constant 0 : index
    %55 = vector.load %arg4[%c0_42, %c0_43] : memref<16x32xf32, #tpu.memory_space<vmem>>, vector<16x32xf32>
    tpu.vector_store %arg4[%c0_42, %c0_43], %54 {strides = array<i32>} : memref<16x32xf32, #tpu.memory_space<vmem>>, vector<16x32xf32>,
    return
  }
  func.func @transform_0(%arg0: i32) -> (i32, i32) {
    %c0_i32 = arith.constant 0 : i32
    %c0_i32_0 = arith.constant 0 : i32
    return %arg0, %c0_i32 : i32, i32
  }
  func.func @transform_1(%arg0: i32) -> (i32, i32, i32) {
    %c0_i32 = arith.constant 0 : i32
    %c0_i32_0 = arith.constant 0 : i32
    %c0_i32_1 = arith.constant 0 : i32
    %c0_i32_2 = arith.constant 0 : i32
    return %c0_i32, %c0_i32_0, %c0_i32_1 : i32, i32, i32
  }
  func.func @transform_2(%arg0: i32) -> (i32, i32, i32) {
    %c0_i32 = arith.constant 0 : i32
    %c0_i32_0 = arith.constant 0 : i32
    %c0_i32_1 = arith.constant 0 : i32
    %c0_i32_2 = arith.constant 0 : i32
    return %c0_i32, %c0_i32_0, %c0_i32_1 : i32, i32, i32
  }
  func.func @transform_3(%arg0: i32) -> (i32, i32) {
    %c0_i32 = arith.constant 0 : i32
    %c0_i32_0 = arith.constant 0 : i32
    return %arg0, %c0_i32 : i32, i32
  }
}

</mosaic_0001>

<bundles_post_ra>
// kernel: autoencoder_forward.1
= control target key start
LH: loop header
LB: loop body
LE: loop exit
PB: predicated region body
PF: predicated region fallthrough
CT: control target
= control target key end

     0   :  { %8 = vsyncpa [#allocation3], 0  ;;  %s1585_s0 = inlined_call_operand.hbm [shape: f32[16,32], index: 0, kind: input, shape index: {}]   ;;  %s1586_s1 = inlined_call_operand.vmem [shape: f32[6,64,64], index: 1, kind: input, shape index: {}]   ;;  %s1587_s2 = inlined_call_operand.vmem [shape: f32[6,64,1], index: 2, kind: input, shape index: {}]   ;;  %s1588_s3 = inlined_call_operand.hbm [shape: f32[16,32], index: 3, kind: output, shape index: {}]  }
   0x1   :  { %9 = vsyncpa [#allocation4], 0  ;;  %s1316_s12 = smov [#allocation2]   ;;  %s1268_s16 = scalar_lea.hbm %s1585_s0, 256 }
   0x2   :  { %s15_s13 = sshll.u32 %s1316_s12, 4  ;;  %p1269_p0 = scmp.ne.s32.totalorder %s1585_s0, %s1268_s16  ;;  %s16_s13 = int_to_ptr.vmem [resolvable:$true] %s15_s13 }
   0x3   :  { %p1272_p1 = scmp.lt.u32.totalorder %s1268_s16, %s1585_s0 }
   0x5   :  { %p1274_p2 = pnand %p1272_p1, %p1269_p0 }
   0x7   :  { %1277 = shalt.err (!%p1274_p2)
}
   0x8   :  { %s1278_s21 = scalar_lea.vmem %s16_s13, 256  ;;  %p1283_p4 = scmp.lt.s32.totalorder %s16_s13, %s16_s13 }
   0x9   :  { %p1279_p3 = scmp.ne.s32.totalorder %s16_s13, %s1278_s21  ;;  %p1284_p5 = scmp.lt.s32.totalorder %s1278_s21, %s1278_s21 }
   0xb   :  { %p1285_p6 = por %p1284_p5, %p1283_p4 }
   0xd   :  { %p1286_p7 = pnand %p1285_p6, %p1279_p3 }
   0xf   :  { %1289 = shalt.err (!%p1286_p7)
}
  0x10   :  { %s1317_s22 = smov 128   ;;  %s1318_s23 = smov 8  }
  0x11   :  { %21 = dma.hbm_to_vmem [thread:$0]  %s1585_s0, 256, %s16_s13, [#allocation3], %s1317_s22, %s1317_s22, %s1318_s23  }
  0x12   :  { %1312 = dma.done.wait [#allocation3], 256  }
  0x13   :  { %1313 = vsyncadd [#allocation3], 4294967040  ;;  %v1319_v0 = vmov 0   ;;  %vm87_vm0 = vcmask 261120   ;;  %v29_v1 = vld [vmem:[#allocation2] sm:$0xff]  ;;  %v30_v2 = vld [vmem:[#allocation2 + $0x8] sm:$0xff] }
  0x14   :  { %1266 = vset.pattern.permute.xlu0 %v1319_v0  ;;  %1267 = vset.pattern.permute.xlu1 %v1319_v0  ;;  %vm1203_vm1 = vmpackc.low %vm87_vm0, %vm87_vm0  ;;  %v31_v3 = vld [vmem:[%s1586_s1] sm:$0xff]  ;;  %v1202_v4 = vpack.c.bf16 %v30_v2, %v29_v1  ;;  %v41_v6 = vld [vmem:[%s1587_s2 + $0x10] sm:$0xff]  ;;  %vm261_vm2 = vcmask 523264   ;;  %vm492_vm3 = vcmask 130048  }
  0x15   :  { %1105 = vmatprep.mubr.msk.f32.mxu0 %vm87_vm0, %v31_v3  ;;  %v39_v5 = vld [vmem:[%s1587_s2] sm:$0xff]  ;;  %59 = vperm.xlu1 %1267, %v41_v6   ;;  %v40_v7 = vld [vmem:[%s1587_s2 + $0x8] sm:$0xff]  ;;  %v42_v8 = vld [vmem:[%s1587_s2 + $0x18] sm:$0xff] }
  0x16   :  { %1204 = vmatprep.subr.msk.bf16.mxu0 %vm1203_vm1, %v1202_v4  ;;  %49 = vperm.xlu0 %1266, %v39_v5   ;;  %v32_v9 = vld [vmem:[%s1586_s1 + $0x8] sm:$0xff]  ;;  %v33_v10 = vld [vmem:[%s1586_s1 + $0x10] sm:$0xff]  ;;  %v43_v11 = vld [vmem:[%s1587_s2 + $0x20] sm:$0xff] }
  0x17   :  { %1207 = vmatpush3.bf16.xpose.msk.msra.mxu0 %vm1203_vm1, %v1202_v4  ;;  %v44_v12 = vld [vmem:[%s1587_s2 + $0x28] sm:$0xff]  ;;  %v34_v13 = vld [vmem:[%s1586_s1 + $0x18] sm:$0xff]  ;;  %v35_v14 = vld [vmem:[%s1586_s1 + $0x20] sm:$0xff] }
  0x18   :  { %v45_v15 = vld [vmem:[%s1587_s2 + $0x30] sm:$0xff]  ;;  %v46_v16 = vld [vmem:[%s1587_s2 + $0x38] sm:$0xff]  ;;  %v36_v17 = vld [vmem:[%s1586_s1 + $0x28] sm:$0xff] }
  0x19   :  { %64 = vperm.xlu1 %1267, %v42_v8   ;;  %v37_v18 = vld [vmem:[%s1586_s1 + $0x30] sm:$0xff]  ;;  %v981_v19 = vld [vmem:[%s1587_s2 + $0x40] sm:$0xff]  ;;  %v982_v20 = vld [vmem:[%s1587_s2 + $0x48] sm:$0xff] }
  0x1a   :  { %54 = vperm.xlu0 %1266, %v40_v7   ;;  %v38_v21 = vld [vmem:[%s1586_s1 + $0x38] sm:$0xff]  ;;  %v983_v22 = vld [vmem:[%s1587_s2 + $0x50] sm:$0xff]  ;;  %v991_v24 = vld [vmem:[%s1587_s2 + $0x80] sm:$0xff] }
  0x1b   :  { %v984_v23 = vld [vmem:[%s1587_s2 + $0x58] sm:$0xff]  ;;  %v992_v25 = vld [vmem:[%s1587_s2 + $0x88] sm:$0xff]  ;;  %v999_v26 = vld [vmem:[%s1587_s2 + $0xc0] sm:$0xff] }
  0x1c   :  { %v1000_v27 = vld [vmem:[%s1587_s2 + $0xc8] sm:$0xff]  ;;  %v1001_v28 = vld [vmem:[%s1587_s2 + $0xd0] sm:$0xff]  ;;  %v1002_v29 = vld [vmem:[%s1587_s2 + $0xd8] sm:$0xff] }
  0x1d   :  { %74 = vperm.xlu1 %1267, %v44_v12   ;;  %v1015_v30 = vld [vmem:[%s1587_s2 + $0x100] sm:$0xff]  ;;  %v1016_v31 = vld [vmem:[%s1587_s2 + $0x108] sm:$0xff]  ;;  %v1017_v32 = vld [vmem:[%s1587_s2 + $0x110] sm:$0xff] }
  0x1e   :  { %1106 = vmatmul.mubr.msk.f32.vlgmr.msra.gmra.mrb[0].mxu0 %vm87_vm0, %v32_v9  ;;  %69 = vperm.xlu0 %1266, %v43_v11   ;;  %v1018_v33 = vld [vmem:[%s1587_s2 + $0x118] sm:$0xff]  ;;  %v1019_v34 = vld [vmem:[%s1587_s2 + $0x120] sm:$0xff]  ;;  %v1020_v35 = vld [vmem:[%s1587_s2 + $0x128] sm:$0xff] }
  0x1f   :  { %1108 = vmatprep.mubr.msk.f32.mxu0 %vm87_vm0, %v33_v10  ;;  %v1021_v36 = vld [vmem:[%s1587_s2 + $0x130] sm:$0xff]  ;;  %v1022_v37 = vld [vmem:[%s1587_s2 + $0x138] sm:$0xff]  ;;  %v1035_v38 = vld [vmem:[%s1587_s2 + $0x140] sm:$0xff] }
  0x20   :  { %v1036_v39 = vld [vmem:[%s1587_s2 + $0x148] sm:$0xff]  ;;  %v1037_v40 = vld [vmem:[%s1587_s2 + $0x150] sm:$0xff]  ;;  %v1038_v41 = vld [vmem:[%s1587_s2 + $0x158] sm:$0xff] }
  0x21   :  { %84 = vperm.xlu1 %1267, %v46_v16   ;;  %v977_v42 = vld [vmem:[%s1586_s1 + $0x40] sm:$0xff]  ;;  %v979_v16 = vld [vmem:[%s1586_s1 + $0x50] sm:$0xff] }
  0x22   :  { %1109 = vmatmul.mubr.msk.f32.gmra.mrb[2].mxu0 %vm87_vm0, %v34_v13  ;;  %79 = vperm.xlu0 %1266, %v45_v15   ;;  %v978_v15 = vld [vmem:[%s1586_s1 + $0x48] sm:$0xff] }
  0x23   :  { %1111 = vmatprep.mubr.msk.f32.mxu0 %vm87_vm0, %v35_v14  ;;  %1133 = vmatprep.mubr.msk.f32.mxu1 %vm261_vm2, %v977_v42 }
  0x25   :  { %248 = vperm.xlu1 %1267, %v982_v20  }
  0x26   :  { %1112 = vmatmul.mubr.msk.f32.gmra.mrb[4].mxu0 %vm87_vm0, %v36_v17  ;;  %243 = vperm.xlu0 %1266, %v981_v19   ;;  %v980_v17 = vld [vmem:[%s1586_s1 + $0x58] sm:$0xff] }
  0x27   :  { %1114 = vmatprep.mubr.msk.f32.mxu0 %vm87_vm0, %v37_v18  ;;  %v989_v18 = vld [vmem:[%s1586_s1 + $0x80] sm:$0xff] }
  0x29   :  { %258 = vperm.xlu1 %1267, %v984_v23  }
  0x2a   :  { %1115 = vmatmul.mubr.msk.f32.gmra.mrb[6].mxu0 %vm87_vm0, %v38_v21  ;;  %253 = vperm.xlu0 %1266, %v983_v22  }
  0x2b   :  { %1147 = vmatprep.mubr.msk.f32.mxu0 %vm87_vm0, %v989_v18 }
  0x2d   :  { %376 = vperm.xlu1 %1267, %v992_v25  }
  0x2e   :  { %371 = vperm.xlu0 %1266, %v991_v24  }
  0x31   :  { %479 = vperm.xlu1 %1267, %v1000_v27  }
  0x32   :  { %474 = vperm.xlu0 %1266, %v999_v26  }
  0x35   :  { %489 = vperm.xlu1 %1267, %v1002_v29  }
  0x36   :  { %484 = vperm.xlu0 %1266, %v1001_v28  }
  0x39   :  { %619 = vperm.xlu1 %1267, %v1016_v31  }
  0x3a   :  { %614 = vperm.xlu0 %1266, %v1015_v30  }
  0x3d   :  { %629 = vperm.xlu1 %1267, %v1018_v33  }
  0x3e   :  { %624 = vperm.xlu0 %1266, %v1017_v32  }
  0x41   :  { %639 = vperm.xlu1 %1267, %v1020_v35  }
  0x42   :  { %634 = vperm.xlu0 %1266, %v1019_v34  }
  0x45   :  { %649 = vperm.xlu1 %1267, %v1022_v37   ;;  %v990_v37 = vld [vmem:[%s1586_s1 + $0x88] sm:$0xff] }
  0x46   :  { %644 = vperm.xlu0 %1266, %v1021_v36  }
  0x49   :  { %806 = vperm.xlu1 %1267, %v1036_v39  }
  0x4a   :  { %801 = vperm.xlu0 %1266, %v1035_v38   ;;  %v995_v38 = vld [vmem:[%s1586_s1 + $0xc0] sm:$0xff] }
  0x4d   :  { %816 = vperm.xlu1 %1267, %v1038_v41  }
  0x4e   :  { %811 = vperm.xlu0 %1266, %v1037_v40  }
  0x94   :  { %v60_v44 = vpop.permute.xlu1 %59 }
  0x95   :  { %v50_v43 = vpop.permute.xlu0 %49 }
  0x98   :  { %v65_v46 = vpop.permute.xlu1 %64 }
  0x99   :  { %v55_v45 = vpop.permute.xlu0 %54 }
  0x9c   :  { %v75_v56 = vpop.permute.xlu1 %74 }
  0x9d   :  { %v70_v59 = vpop.permute.xlu0 %69 }
  0xa0   :  { %v85_v4 = vpop.permute.xlu1 %84 }
  0xa1   :  { %v80_v7 = vpop.permute.xlu0 %79 }
  0xa4   :  { %v249_v19 = vpop.permute.xlu1 %248 }
  0xa5   :  { %v244_v20 = vpop.permute.xlu0 %243 }
  0xa8   :  { %v259_v26 = vpop.permute.xlu1 %258 }
  0xa9   :  { %v254_v29 = vpop.permute.xlu0 %253 }
  0xac   :  { %v377_v39 = vpop.permute.xlu1 %376 }
  0xad   :  { %v372_v41 = vpop.permute.xlu0 %371 }
  0xf1   :  { %v1107_v47 = vpop.f32.mrb[0].mxu0 }
  0xf2   :  { %v190_v48 = vadd.f32 %v1107_v47, %v55_v45  ;;  %v184_v49 = vpop.f32.mrb[1].mxu0 }
  0xf3   :  { %v185_v50 = vadd.f32 %v184_v49, %v50_v43  ;;  %v997_v49 = vld [vmem:[%s1586_s1 + $0xd0] sm:$0xff] }
  0xf4   :  { %v224_v51 = vmax.f32 %v190_v48, 0.0  ;;  %v996_v48 = vld [vmem:[%s1586_s1 + $0xc8] sm:$0xff] }
  0xf5   :  { %v223_v52 = vmax.f32 %v185_v50, 0.0  ;;  %v1110_v53 = vpop.f32.mrb[2].mxu0  ;;  %v998_v50 = vld [vmem:[%s1586_s1 + $0xd8] sm:$0xff] }
  0xf6   :  { %v200_v54 = vadd.f32 %v1110_v53, %v65_v46  ;;  %v194_v55 = vpop.f32.mrb[3].mxu0  ;;  %v475_v53 = vpop.permute.xlu0 %474 }
  0xf7   :  { %v195_v57 = vadd.f32 %v194_v55, %v60_v44  ;;  %v1208_v58 = vpack.c.bf16 %v224_v51, %v223_v52  ;;  %v1007_v51 = vld [vmem:[%s1586_s1 + $0x100] sm:$0xff]  ;;  %v480_v52 = vpop.permute.xlu1 %479 }
  0xf8   :  { %v226_v60 = vmax.f32 %v200_v54, 0.0 }
  0xf9   :  { %v225_v61 = vmax.f32 %v195_v57, 0.0  ;;  %v1113_v62 = vpop.f32.mrb[4].mxu0  ;;  %1209 = vmatprep.subr.bf16.mxu1 %v1208_v58 }
  0xfa   :  { %v210_v63 = vadd.f32 %v1113_v62, %v75_v56  ;;  %v204_v0 = vpop.f32.mrb[5].mxu0  ;;  %1211 = vmatpush3.bf16.msra.mxu1 %v1208_v58  ;;  %v485_v62 = vpop.permute.xlu0 %484 }
  0xfb   :  { %v1212_v1 = vpack.c.bf16 %v226_v60, %v225_v61  ;;  %v205_v2 = vadd.f32 %v204_v0, %v70_v59  ;;  %v490_v59 = vpop.permute.xlu1 %489 }
  0xfc   :  { %v228_v3 = vmax.f32 %v210_v63, 0.0 }
  0xfd   :  { %v227_v5 = vmax.f32 %v205_v2, 0.0  ;;  %v1116_v6 = vpop.f32.mrb[6].mxu0  ;;  %1213 = vmatprep.subr.bf16.mxu1 %v1212_v1 }
  0xfe   :  { %v220_v8 = vadd.f32 %v1116_v6, %v85_v4  ;;  %v214_v9 = vpop.f32.mrb[7].mxu0  ;;  %1215 = vmatpush3.bf16.msra.mxu1 %v1212_v1  ;;  %v1008_v6 = vld [vmem:[%s1586_s1 + $0x108] sm:$0xff] }
  0xff   :  { %v1216_v10 = vpack.c.bf16 %v228_v3, %v227_v5  ;;  %v215_v11 = vadd.f32 %v214_v9, %v80_v7  ;;  %v1009_v7 = vld [vmem:[%s1586_s1 + $0x110] sm:$0xff]  ;;  %v1011_v9 = vld [vmem:[%s1586_s1 + $0x120] sm:$0xff] }
 0x100   :  { %v230_v12 = vmax.f32 %v220_v8, 0.0  ;;  %v1010_v8 = vld [vmem:[%s1586_s1 + $0x118] sm:$0xff] }
 0x101   :  { %v229_v13 = vmax.f32 %v215_v11, 0.0  ;;  %1217 = vmatprep.subr.bf16.mxu1 %v1216_v10  ;;  %v1013_v11 = vld [vmem:[%s1586_s1 + $0x130] sm:$0xff] }
 0x102   :  { %1219 = vmatpush3.bf16.msra.mxu1 %v1216_v10  ;;  %v1012_v10 = vld [vmem:[%s1586_s1 + $0x128] sm:$0xff] }
 0x103   :  { %v1220_v14 = vpack.c.bf16 %v230_v12, %v229_v13  ;;  %v1014_v12 = vld [vmem:[%s1586_s1 + $0x138] sm:$0xff]  ;;  %v1031_v13 = vld [vmem:[%s1586_s1 + $0x140] sm:$0xff] }
 0x105   :  { %1221 = vmatprep.subr.bf16.mxu1 %v1220_v14 }
 0x106   :  { %1223 = vmatpush3.bf16.msra.mxu1 %v1220_v14  ;;  %v620_v14 = vpop.permute.xlu1 %619 }
 0x109   :  { %1134 = vmatmul.mubr.msk.f32.vlgmr.msra.gmra.mrb[0].mxu1 %vm261_vm2, %v978_v15  ;;  %v615_v15 = vpop.permute.xlu0 %614 }
 0x10a   :  { %1136 = vmatprep.mubr.msk.f32.mxu1 %vm261_vm2, %v979_v16  ;;  %v630_v16 = vpop.permute.xlu1 %629 }
 0x10d   :  { %1137 = vmatmul.mubr.msk.f32.gmra.mrb[2].mxu1 %vm261_vm2, %v980_v17  ;;  %v625_v18 = vpop.permute.xlu0 %624 }
 0x10e   :  { %1154 = vmatprep.mubr.msk.f32.mxu1 %vm492_vm3, %v995_v38 }
 0x1dc   :  { %v1135_v21 = vpop.f32.mrb[0].mxu1 }
 0x1dd   :  { %v346_v22 = vadd.f32 %v1135_v21, %v249_v19  ;;  %v340_v23 = vpop.f32.mrb[1].mxu1 }
 0x1de   :  { %v341_v24 = vadd.f32 %v340_v23, %v244_v20 }
 0x1df   :  { %v360_v25 = vmax.f32 %v346_v22, 0.0 }
 0x1e0   :  { %v359_v27 = vmax.f32 %v341_v24, 0.0  ;;  %v1138_v28 = vpop.f32.mrb[2].mxu1 }
 0x1e1   :  { %v356_v30 = vadd.f32 %v1138_v28, %v259_v26  ;;  %v350_v31 = vpop.f32.mrb[3].mxu1 }
 0x1e2   :  { %v1224_v32 = vpack.c.bf16 %v360_v25, %v359_v27  ;;  %v351_v33 = vadd.f32 %v350_v31, %v254_v29  ;;  %v640_v27 = vpop.permute.xlu1 %639 }
 0x1e3   :  { %v362_v34 = vmax.f32 %v356_v30, 0.0  ;;  %v635_v30 = vpop.permute.xlu0 %634 }
 0x1e4   :  { %v361_v35 = vmax.f32 %v351_v33, 0.0  ;;  %1225 = vmatprep.subr.bf16.mxu0 %v1224_v32 }
 0x1e5   :  { %1227 = vmatpush3.bf16.msra.mxu0 %v1224_v32 }
 0x1e6   :  { %v1228_v36 = vpack.c.bf16 %v362_v34, %v361_v35 }
 0x1e8   :  { %1229 = vmatprep.subr.bf16.mxu0 %v1228_v36 }
 0x1e9   :  { %1231 = vmatpush3.bf16.msra.mxu0 %v1228_v36 }
 0x1ec   :  { %1148 = vmatmul.mubr.msk.f32.vlgmr.msra.gmra.mrb[8].mxu0 %vm87_vm0, %v990_v37 }
 0x1ed   :  { %1168 = vmatprep.mubr.msk.f32.mxu0 %vm87_vm0, %v1007_v51  ;;  %v1033_v51 = vld [vmem:[%s1586_s1 + $0x150] sm:$0xff] }
 0x2bf   :  { %v1149_v40 = vpop.f32.mrb[8].mxu0 }
 0x2c0   :  { %v457_v42 = vadd.f32 %v1149_v40, %v377_v39  ;;  %v451_v43 = vpop.f32.mrb[9].mxu0  ;;  %v650_v39 = vpop.permute.xlu1 %649 }
 0x2c1   :  { %v452_v44 = vadd.f32 %v451_v43, %v372_v41 }
 0x2c2   :  { %v461_v45 = vmax.f32 %v457_v42, 0.0  ;;  %v645_v42 = vpop.permute.xlu0 %644 }
 0x2c3   :  { %v460_v46 = vmax.f32 %v452_v44, 0.0 }
 0x2c5   :  { %v1232_v47 = vpack.c.bf16 %v461_v45, %v460_v46 }
 0x2c7   :  { %1233 = vmatprep.subr.bf16.mxu1 %v1232_v47 }
 0x2c8   :  { %1235 = vmatpush3.bf16.msra.mxu1 %v1232_v47 }
 0x2cb   :  { %1155 = vmatmul.mubr.msk.f32.vlgmr.msra.gmra.mrb[4].mxu1 %vm492_vm3, %v996_v48 }
 0x2cc   :  { %1157 = vmatprep.mubr.msk.f32.mxu1 %vm492_vm3, %v997_v49 }
 0x2cf   :  { %1158 = vmatmul.mubr.msk.f32.gmra.mrb[6].mxu1 %vm492_vm3, %v998_v50  ;;  %v1032_v50 = vld [vmem:[%s1586_s1 + $0x148] sm:$0xff] }
 0x2d0   :  { %1196 = vmatprep.mubr.msk.f32.mxu1 %vm261_vm2, %v1031_v13 }
 0x39e   :  { %v1156_v54 = vpop.f32.mrb[4].mxu1 }
 0x39f   :  { %v577_v55 = vadd.f32 %v1156_v54, %v480_v52  ;;  %v571_v56 = vpop.f32.mrb[5].mxu1  ;;  %v1034_v52 = vld [vmem:[%s1586_s1 + $0x158] sm:$0xff]  ;;  %v802_v54 = vpop.permute.xlu0 %801  ;;  %s1320_s1 = smov [#allocation5]  }
 0x3a0   :  { %v572_v57 = vadd.f32 %v571_v56, %v475_v53  ;;  %s955_s12 = sshll.u32 %s1320_s1, 4  ;;  %s956_s12 = int_to_ptr.vmem [resolvable:$true] %s955_s12 }
 0x3a1   :  { %v591_v58 = vmax.f32 %v577_v55, 0.0  ;;  %s1290_s13 = scalar_lea.vmem %s956_s12, 256  ;;  %p1295_p9 = scmp.lt.s32.totalorder %s956_s12, %s956_s12 }
 0x3a2   :  { %v590_v60 = vmax.f32 %v572_v57, 0.0  ;;  %v1159_v61 = vpop.f32.mrb[6].mxu1  ;;  %p1291_p8 = scmp.ne.s32.totalorder %s956_s12, %s1290_s13  ;;  %p1296_p10 = scmp.lt.s32.totalorder %s1290_s13, %s1290_s13 }
 0x3a3   :  { %v587_v63 = vadd.f32 %v1159_v61, %v490_v59  ;;  %v581_v0 = vpop.f32.mrb[7].mxu1  ;;  %v812_v61 = vpop.permute.xlu0 %811 }
 0x3a4   :  { %v1236_v1 = vpack.c.bf16 %v591_v58, %v590_v60  ;;  %v582_v2 = vadd.f32 %v581_v0, %v485_v62  ;;  %v807_v58 = vpop.permute.xlu1 %806  ;;  %p1297_p11 = por %p1296_p10, %p1295_p9 }
 0x3a5   :  { %v593_v3 = vmax.f32 %v587_v63, 0.0 }
 0x3a6   :  { %v592_v4 = vmax.f32 %v582_v2, 0.0  ;;  %1237 = vmatprep.subr.bf16.mxu0 %v1236_v1  ;;  %p1298_p12 = pnand %p1297_p11, %p1291_p8 }
 0x3a7   :  { %1239 = vmatpush3.bf16.msra.mxu0 %v1236_v1 }
 0x3a8   :  { %v1240_v5 = vpack.c.bf16 %v593_v3, %v592_v4  ;;  %v817_v63 = vpop.permute.xlu1 %816 }
 0x3aa   :  { %1241 = vmatprep.subr.bf16.mxu0 %v1240_v5 }
 0x3ab   :  { %1243 = vmatpush3.bf16.msra.mxu0 %v1240_v5 }
 0x3ae   :  { %1169 = vmatmul.mubr.msk.f32.vlgmr.msra.gmra.mrb[10].mxu0 %vm87_vm0, %v1008_v6 }
 0x3af   :  { %1171 = vmatprep.mubr.msk.f32.mxu0 %vm87_vm0, %v1009_v7 }
 0x3b2   :  { %1172 = vmatmul.mubr.msk.f32.gmra.mrb[12].mxu0 %vm87_vm0, %v1010_v8 }
 0x3b3   :  { %1174 = vmatprep.mubr.msk.f32.mxu0 %vm87_vm0, %v1011_v9 }
 0x3b6   :  { %1175 = vmatmul.mubr.msk.f32.gmra.mrb[14].mxu0 %vm87_vm0, %v1012_v10 }
 0x3b7   :  { %1177 = vmatprep.mubr.msk.f32.mxu0 %vm87_vm0, %v1013_v11 }
 0x3ba   :  { %1178 = vmatmul.mubr.msk.f32.gmra.mrb[16].mxu0 %vm87_vm0, %v1014_v12 }
 0x481   :  { %v1170_v17 = vpop.f32.mrb[10].mxu0 }
 0x482   :  { %v748_v19 = vadd.f32 %v1170_v17, %v620_v14  ;;  %v742_v20 = vpop.f32.mrb[11].mxu0 }
 0x483   :  { %v743_v21 = vadd.f32 %v742_v20, %v615_v15 }
 0x484   :  { %v782_v22 = vmax.f32 %v748_v19, 0.0 }
 0x485   :  { %v781_v23 = vmax.f32 %v743_v21, 0.0  ;;  %v1173_v24 = vpop.f32.mrb[12].mxu0 }
 0x486   :  { %v758_v25 = vadd.f32 %v1173_v24, %v630_v16  ;;  %v752_v26 = vpop.f32.mrb[13].mxu0 }
 0x487   :  { %v1244_v28 = vpack.c.bf16 %v782_v22, %v781_v23  ;;  %v753_v29 = vadd.f32 %v752_v26, %v625_v18 }
 0x488   :  { %v784_v31 = vmax.f32 %v758_v25, 0.0 }
 0x489   :  { %v783_v32 = vmax.f32 %v753_v29, 0.0  ;;  %v1176_v33 = vpop.f32.mrb[14].mxu0  ;;  %1245 = vmatprep.subr.bf16.mxu1 %v1244_v28 }
 0x48a   :  { %v768_v34 = vadd.f32 %v1176_v33, %v640_v27  ;;  %v762_v35 = vpop.f32.mrb[15].mxu0  ;;  %1247 = vmatpush3.bf16.msra.mxu1 %v1244_v28 }
 0x48b   :  { %v1248_v36 = vpack.c.bf16 %v784_v31, %v783_v32  ;;  %v763_v37 = vadd.f32 %v762_v35, %v635_v30 }
 0x48c   :  { %v786_v38 = vmax.f32 %v768_v34, 0.0 }
 0x48d   :  { %v785_v40 = vmax.f32 %v763_v37, 0.0  ;;  %v1179_v41 = vpop.f32.mrb[16].mxu0  ;;  %1249 = vmatprep.subr.bf16.mxu1 %v1248_v36 }
 0x48e   :  { %v778_v43 = vadd.f32 %v1179_v41, %v650_v39  ;;  %v772_v44 = vpop.f32.mrb[17].mxu0  ;;  %1251 = vmatpush3.bf16.msra.mxu1 %v1248_v36 }
 0x48f   :  { %v1252_v45 = vpack.c.bf16 %v786_v38, %v785_v40  ;;  %v773_v46 = vadd.f32 %v772_v44, %v645_v42 }
 0x490   :  { %v788_v47 = vmax.f32 %v778_v43, 0.0 }
 0x491   :  { %v787_v48 = vmax.f32 %v773_v46, 0.0  ;;  %1253 = vmatprep.subr.bf16.mxu1 %v1252_v45 }
 0x492   :  { %1255 = vmatpush3.bf16.msra.mxu1 %v1252_v45 }
 0x493   :  { %v1256_v49 = vpack.c.bf16 %v788_v47, %v787_v48 }
 0x495   :  { %1257 = vmatprep.subr.bf16.mxu1 %v1256_v49 }
 0x496   :  { %1259 = vmatpush3.bf16.msra.mxu1 %v1256_v49 }
 0x499   :  { %1197 = vmatmul.mubr.msk.f32.vlgmr.msra.gmra.mrb[8].mxu1 %vm261_vm2, %v1032_v50 }
 0x49a   :  { %1199 = vmatprep.mubr.msk.f32.mxu1 %vm261_vm2, %v1033_v51 }
 0x49d   :  { %1200 = vmatmul.mubr.msk.f32.gmra.mrb[10].mxu1 %vm261_vm2, %v1034_v52 }
 0x56c   :  { %v1198_v53 = vpop.f32.mrb[8].mxu1 }
 0x56d   :  { %v897_v55 = vpop.f32.mrb[9].mxu1  ;;  %v903_v60 = vadd.f32 %v1198_v53, %v807_v58 }
 0x56e   :  { %v898_v56 = vadd.f32 %v897_v55, %v802_v54 }
 0x570   :  { %v1201_v57 = vpop.f32.mrb[10].mxu1  ;;  %916 = vxpose.xlu0.b32.start [1/4] (short) (narrow) %v898_v56, 16 }
 0x571   :  { %v907_v59 = vpop.f32.mrb[11].mxu1  ;;  %v913_v0 = vadd.f32 %v1201_v57, %v817_v63 }
 0x572   :  { %v908_v62 = vadd.f32 %v907_v59, %v812_v61 }
 0x574   :  { %917 = vxpose.xlu0.b32.cont [2/4] (short) (narrow) %v903_v60, 16 }
 0x578   :  { %918 = vxpose.xlu0.b32.cont [3/4] (short) (narrow) %v908_v62, 16 }
 0x57c   :  { %919 = vxpose.xlu0.b32.end [4/4] (short) (narrow) %v913_v0, 16 }
 0x5f0   :  { %v932_v1 = vpop.trf.xlu0 }
 0x5f1   :  { %948 = vst.msk [vmem:[#allocation5] sm:$0xff] %vm87_vm0, %v932_v1 }
 0x5f4   :  { %v933_v2 = vpop.trf.xlu0 }
 0x5f5   :  { %949 = vst.msk [vmem:[#allocation5 + $0x8] sm:$0xff] %vm87_vm0, %v933_v2 }
 0x5f6   :  { %1301 = shalt.err (!%p1298_p12)
}
 0x5f7   :  { %s1302_s16 = scalar_lea.hbm %s1588_s3, 256 }
 0x5f8   :  { %p1303_p13 = scmp.ne.s32.totalorder %s1588_s3, %s1302_s16  ;;  %p1306_p0 = scmp.lt.u32.totalorder %s1302_s16, %s1588_s3 }
 0x5fa   :  { %p1308_p1 = pnand %p1306_p0, %p1303_p13 }
 0x5fc   :  { %1311 = shalt.err (!%p1308_p1)
}
 0x5fd   :  { %961 = dma.vmem_to_hbm [thread:$0]  %s956_s12, 256, %s1588_s3, [#allocation4], %s1317_s22, %s1317_s22, %s1318_s23  }
 0x5fe   :  { %1314 = dma.done.wait [#allocation4], 256  }
 0x5ff   :  { %1315 = vsyncadd [#allocation4], 4294967040 }
 0x600   :  { %965 = vsyncpa [#allocation3], 1 }
 0x601   :  { %966 = vsyncpa [#allocation4], 1 }

</bundles_post_ra>
